<compile_context>
chip_gen: v5e
topology: v5e:2x2
jax: 0.10.0
libtpu: 0.0.40
codegen_flags: <defaults>
</compile_context>

<pallas_src>
import jax
import jax.numpy as jnp
from jax.experimental import pallas as pl
from jax.experimental.pallas import tpu as pltpu

INPUT_SIZE = 10      # num_features
HIDDEN_SIZE = 128
OUTPUT_SIZE = 4      # num_clusters
OUTPUT_PAD = 128     # lane-dense padded output width


def _round_up(x, m):
    return ((x + m - 1) // m) * m


def mlp_kernel(x_ref, w1_ref, b1_ref, w2_ref, b2_ref, w3_ref, b3_ref, o_ref):
    # Matmul operands in bf16 (MXU-native), accumulate in f32,
    # bias/ReLU elementwise math in f32.
    x = x_ref[...].astype(jnp.bfloat16)
    # fc1 + ReLU
    h1 = jnp.dot(x, w1_ref[...], preferred_element_type=jnp.float32)
    h1 = jnp.maximum(h1 + b1_ref[...], 0.0)
    # fc2 + ReLU
    h2 = jnp.dot(h1.astype(jnp.bfloat16), w2_ref[...],
                 preferred_element_type=jnp.float32)
    h2 = jnp.maximum(h2 + b2_ref[...], 0.0)
    # fc3 (no activation), padded to 128 output lanes -> dense vst
    out = jnp.dot(h2.astype(jnp.bfloat16), w3_ref[...],
                  preferred_element_type=jnp.float32)
    o_ref[...] = (out + b3_ref[...]).astype(o_ref.dtype)


def mlp_forward(x, params, tb=1024):
    """x: [B, INPUT_SIZE] f32; params: (w1,b1,w2,b2,w3,b3) f32. Returns [B, 4] f32."""
    w1, b1, w2, b2, w3, b3 = params
    B, K = x.shape
    H = w1.shape[1]
    OUT = w3.shape[1]

    # Pad fc3 to a lane-dense (H, 128) / (1, 128); wrapper slices back to OUT.
    w3p = jnp.zeros((H, OUTPUT_PAD), w3.dtype).at[:, :OUT].set(w3)
    b3p = jnp.zeros((1, OUTPUT_PAD), b3.dtype).at[:, :OUT].set(b3)

    # Batch tile: multiple of 8 sublanes; shrink for small batches.
    tb = max(8, min(_round_up(tb, 8), _round_up(B, 8)))
    B_pad = _round_up(B, tb)
    if B_pad != B:
        x = jnp.zeros((B_pad, K), x.dtype).at[:B].set(x)

    # bf16 weights for the MXU (halves resident-weight VMEM / DMA bytes).
    w1_bf = w1.astype(jnp.bfloat16)
    w2_bf = w2.astype(jnp.bfloat16)
    w3_bf = w3p.astype(jnp.bfloat16)

    grid = (B_pad // tb,)
    out = pl.pallas_call(
        mlp_kernel,
        out_shape=jax.ShapeDtypeStruct((B_pad, OUTPUT_PAD), jnp.float32),
        grid=grid,
        in_specs=[
            pl.BlockSpec((tb, K), lambda i: (i, 0)),          # x: tiled over batch
            pl.BlockSpec((K, H), lambda i: (0, 0)),           # w1: resident
            pl.BlockSpec((1, H), lambda i: (0, 0)),           # b1: resident
            pl.BlockSpec((H, H), lambda i: (0, 0)),           # w2: resident
            pl.BlockSpec((1, H), lambda i: (0, 0)),           # b2: resident
            pl.BlockSpec((H, OUTPUT_PAD), lambda i: (0, 0)),  # w3 (padded): resident
            pl.BlockSpec((1, OUTPUT_PAD), lambda i: (0, 0)),  # b3 (padded): resident
        ],
        out_specs=pl.BlockSpec((tb, OUTPUT_PAD), lambda i: (i, 0)),
        compiler_params=pltpu.CompilerParams(
            dimension_semantics=("parallel",),
        ),
    )(x, w1_bf, b1, w2_bf, b2, w3_bf, b3p)

    return out[:B, :OUT]


def init_linear(key, fan_in, fan_out):
    # Mimic torch.nn.Linear default init: U(-1/sqrt(fan_in), 1/sqrt(fan_in)).
    kw, kb = jax.random.split(key)
    bound = 1.0 / (fan_in ** 0.5)
    w = jax.random.uniform(kw, (fan_in, fan_out), jnp.float32, -bound, bound)
    b = jax.random.uniform(kb, (1, fan_out), jnp.float32, -bound, bound)
    return w, b


def reference_mlp_f32(x, params):
    w1, b1, w2, b2, w3, b3 = params
    h = jnp.maximum(x @ w1 + b1, 0.0)
    h = jnp.maximum(h @ w2 + b2, 0.0)
    return h @ w3 + b3


def reference_mlp_bf16(x, params):
    # Mirrors the kernel's numerics: bf16 matmul operands, f32 accumulation,
    # f32 bias / ReLU.
    w1, b1, w2, b2, w3, b3 = params
    bf = jnp.bfloat16
    h = jnp.dot(x.astype(bf), w1.astype(bf), preferred_element_type=jnp.float32)
    h = jnp.maximum(h + b1, 0.0)
    h = jnp.dot(h.astype(bf), w2.astype(bf), preferred_element_type=jnp.float32)
    h = jnp.maximum(h + b2, 0.0)
    out = jnp.dot(h.astype(bf), w3.astype(bf), preferred_element_type=jnp.float32)
    return out + b3


if __name__ == "__main__":
    key = jax.random.PRNGKey(0)
    k_x, k1, k2, k3 = jax.random.split(key, 4)

    batch = 13  # non-multiple of the tile to exercise padding + grid
    x = jax.random.normal(k_x, (batch, INPUT_SIZE), jnp.float32)

    w1, b1 = init_linear(k1, INPUT_SIZE, HIDDEN_SIZE)
    w2, b2 = init_linear(k2, HIDDEN_SIZE, HIDDEN_SIZE)
    w3, b3 = init_linear(k3, HIDDEN_SIZE, OUTPUT_SIZE)
    params = (w1, b1, w2, b2, w3, b3)

    # Small tile so the grid has >1 step even at this tiny test batch.
    out = mlp_forward(x, params, tb=8)
    out = jax.block_until_ready(out)

    assert out.shape == (batch, OUTPUT_SIZE)

    # Tight check against a reference with identical (bf16-operand) numerics.
    ref_bf16 = reference_mlp_bf16(x, params)
    assert jnp.allclose(out, ref_bf16, atol=1e-4, rtol=1e-4)

    # Coarse check against the original f32 PyTorch-equivalent math.
    ref_f32 = reference_mlp_f32(x, params)
    assert jnp.allclose(out, ref_f32, atol=5e-2, rtol=5e-2)

    print("KERNEL_OK")
</pallas_src>

<mosaic_0001>
module attributes {stable_mosaic.version = 11 : i64} {
  func.func @mlp_kernel(%arg0: i32, %arg1: memref<8x10xf32, #tpu.memory_space<vmem>>, %arg2: memref<10x128xbf16, #tpu.memory_space<vmem>>, %arg3: memref<1x128xf32, #tpu.memory_space<vmem>>, %arg4: memref<128x128xbf16, #tpu.memory_space<vmem>>, %arg5: memref<1x128xf32, #tpu.memory_space<vmem>>, %arg6: memref<128x128xbf16, #tpu.memory_space<vmem>>, %arg7: memref<1x128xf32, #tpu.memory_space<vmem>>, %arg8: memref<8x128xf32, #tpu.memory_space<vmem>>) attributes {dimension_semantics = [#tpu.dimension_semantics<parallel>], iteration_bounds = array<i64: 2>, scalar_prefetch = 0 : i64, scratch_operands = 0 : i64, tpu.core_type = #tpu.core_type<tc>, window_params = [{transform_indices = @transform_0, window_bounds = array<i64: 8, 10>}, {pipeline_mode = #tpu.pipeline_mode<synchronous>, transform_indices = @transform_1, window_bounds = array<i64: 10, 128>}, {pipeline_mode = #tpu.pipeline_mode<synchronous>, transform_indices = @transform_2, window_bounds = array<i64: 1, 128>}, {pipeline_mode = #tpu.pipeline_mode<synchronous>, transform_indices = @transform_3, window_bounds = array<i64: 128, 128>}, {pipeline_mode = #tpu.pipeline_mode<synchronous>, transform_indices = @transform_4, window_bounds = array<i64: 1, 128>}, {pipeline_mode = #tpu.pipeline_mode<synchronous>, transform_indices = @transform_5, window_bounds = array<i64: 128, 128>}, {pipeline_mode = #tpu.pipeline_mode<synchronous>, transform_indices = @transform_6, window_bounds = array<i64: 1, 128>}, {transform_indices = @transform_7, window_bounds = array<i64: 8, 128>}]} {
    %c0 = arith.constant 0 : index
    %c0_0 = arith.constant 0 : index
    %0 = vector.load %arg1[%c0, %c0_0] : memref<8x10xf32, #tpu.memory_space<vmem>>, vector<8x10xf32>
    %1 = arith.truncf %0 : vector<8x10xf32> to vector<8x10xbf16>
    %c0_1 = arith.constant 0 : index
    %c0_2 = arith.constant 0 : index
    %2 = vector.load %arg2[%c0_1, %c0_2] : memref<10x128xbf16, #tpu.memory_space<vmem>>, vector<10x128xbf16>
    %cst = arith.constant dense<0.000000e+00> : vector<8x128xf32>
    %3 = tpu.matmul %1, %2, %cst {dimension_numbers = #tpu.dot_dimension_numbers<[1], [0], [0], [1], [0, 0, 1, 1], [], []>} : vector<8x10xbf16>, vector<10x128xbf16>, vector<8x128xf32> -> vector<8x128xf32>
    %c0_3 = arith.constant 0 : index
    %c0_4 = arith.constant 0 : index
    %4 = vector.load %arg3[%c0_3, %c0_4] : memref<1x128xf32, #tpu.memory_space<vmem>>, vector<1x128xf32>
    %5 = vector.broadcast %4 : vector<1x128xf32> to vector<8x128xf32>
    %6 = arith.addf %3, %5 : vector<8x128xf32>
    %cst_5 = arith.constant 0.000000e+00 : f32
    %7 = vector.broadcast %cst_5 : f32 to vector<8x128xf32>
    %8 = arith.maximumf %6, %7 : vector<8x128xf32>
    %9 = arith.truncf %8 : vector<8x128xf32> to vector<8x128xbf16>
    %c0_6 = arith.constant 0 : index
    %c0_7 = arith.constant 0 : index
    %10 = vector.load %arg4[%c0_6, %c0_7] : memref<128x128xbf16, #tpu.memory_space<vmem>>, vector<128x128xbf16>
    %cst_8 = arith.constant dense<0.000000e+00> : vector<8x128xf32>
    %11 = tpu.matmul %9, %10, %cst_8 {dimension_numbers = #tpu.dot_dimension_numbers<[1], [0], [0], [1], [0, 0, 1, 1], [], []>} : vector<8x128xbf16>, vector<128x128xbf16>, vector<8x128xf32> -> vector<8x128xf32>
    %c0_9 = arith.constant 0 : index
    %c0_10 = arith.constant 0 : index
    %12 = vector.load %arg5[%c0_9, %c0_10] : memref<1x128xf32, #tpu.memory_space<vmem>>, vector<1x128xf32>
    %13 = vector.broadcast %12 : vector<1x128xf32> to vector<8x128xf32>
    %14 = arith.addf %11, %13 : vector<8x128xf32>
    %cst_11 = arith.constant 0.000000e+00 : f32
    %15 = vector.broadcast %cst_11 : f32 to vector<8x128xf32>
    %16 = arith.maximumf %14, %15 : vector<8x128xf32>
    %17 = arith.truncf %16 : vector<8x128xf32> to vector<8x128xbf16>
    %c0_12 = arith.constant 0 : index
    %c0_13 = arith.constant 0 : index
    %18 = vector.load %arg6[%c0_12, %c0_13] : memref<128x128xbf16, #tpu.memory_space<vmem>>, vector<128x128xbf16>
    %cst_14 = arith.constant dense<0.000000e+00> : vector<8x128xf32>
    %19 = tpu.matmul %17, %18, %cst_14 {dimension_numbers = #tpu.dot_dimension_numbers<[1], [0], [0], [1], [0, 0, 1, 1], [], []>} : vector<8x128xbf16>, vector<128x128xbf16>, vector<8x128xf32> -> vector<8x128xf32>
    %c0_15 = arith.constant 0 : index
    %c0_16 = arith.constant 0 : index
    %20 = vector.load %arg7[%c0_15, %c0_16] : memref<1x128xf32, #tpu.memory_space<vmem>>, vector<1x128xf32>
    %21 = vector.broadcast %20 : vector<1x128xf32> to vector<8x128xf32>
    %22 = arith.addf %19, %21 : vector<8x128xf32>
    %c0_17 = arith.constant 0 : index
    %c0_18 = arith.constant 0 : index
    %23 = vector.load %arg8[%c0_17, %c0_18] : memref<8x128xf32, #tpu.memory_space<vmem>>, vector<8x128xf32>
    tpu.vector_store %arg8[%c0_17, %c0_18], %22 {strides = array<i32>} : memref<8x128xf32, #tpu.memory_space<vmem>>, vector<8x128xf32>,
    return
  }
  func.func @transform_0(%arg0: i32) -> (i32, i32) {
    %c0_i32 = arith.constant 0 : i32
    %c0_i32_0 = arith.constant 0 : i32
    return %arg0, %c0_i32 : i32, i32
  }
  func.func @transform_1(%arg0: i32) -> (i32, i32) {
    %c0_i32 = arith.constant 0 : i32
    %c0_i32_0 = arith.constant 0 : i32
    %c0_i32_1 = arith.constant 0 : i32
    return %c0_i32, %c0_i32_0 : i32, i32
  }
  func.func @transform_2(%arg0: i32) -> (i32, i32) {
    %c0_i32 = arith.constant 0 : i32
    %c0_i32_0 = arith.constant 0 : i32
    %c0_i32_1 = arith.constant 0 : i32
    return %c0_i32, %c0_i32_0 : i32, i32
  }
  func.func @transform_3(%arg0: i32) -> (i32, i32) {
    %c0_i32 = arith.constant 0 : i32
    %c0_i32_0 = arith.constant 0 : i32
    %c0_i32_1 = arith.constant 0 : i32
    return %c0_i32, %c0_i32_0 : i32, i32
  }
  func.func @transform_4(%arg0: i32) -> (i32, i32) {
    %c0_i32 = arith.constant 0 : i32
    %c0_i32_0 = arith.constant 0 : i32
    %c0_i32_1 = arith.constant 0 : i32
    return %c0_i32, %c0_i32_0 : i32, i32
  }
  func.func @transform_5(%arg0: i32) -> (i32, i32) {
    %c0_i32 = arith.constant 0 : i32
    %c0_i32_0 = arith.constant 0 : i32
    %c0_i32_1 = arith.constant 0 : i32
    return %c0_i32, %c0_i32_0 : i32, i32
  }
  func.func @transform_6(%arg0: i32) -> (i32, i32) {
    %c0_i32 = arith.constant 0 : i32
    %c0_i32_0 = arith.constant 0 : i32
    %c0_i32_1 = arith.constant 0 : i32
    return %c0_i32, %c0_i32_0 : i32, i32
  }
  func.func @transform_7(%arg0: i32) -> (i32, i32) {
    %c0_i32 = arith.constant 0 : i32
    %c0_i32_0 = arith.constant 0 : i32
    return %arg0, %c0_i32 : i32, i32
  }
}

</mosaic_0001>

<bundles_post_ra>
// kernel: tpu_custom_call.1
= control target key start
LH: loop header
LB: loop body
LE: loop exit
PB: predicated region body
PF: predicated region fallthrough
CT: control target
= control target key end

     0   :  { %s1259_s0 = inlined_call_operand.hbm [shape: f32[16,10], index: 0, kind: input, shape index: {}]   ;;  %s1260_s1 = inlined_call_operand.hbm [shape: bf16[10,128], index: 1, kind: input, shape index: {}]   ;;  %s1261_s2 = inlined_call_operand.vmem [shape: f32[1,128], index: 2, kind: input, shape index: {}]   ;;  %s1262_s3 = inlined_call_operand.hbm [shape: bf16[128,128], index: 3, kind: input, shape index: {}]   ;;  %s1263_s4 = inlined_call_operand.vmem [shape: f32[1,128], index: 4, kind: input, shape index: {}]   ;;  %s1264_s5 = inlined_call_operand.hbm [shape: bf16[128,128], index: 5, kind: input, shape index: {}]   ;;  %s1265_s6 = inlined_call_operand.vmem [shape: f32[1,128], index: 6, kind: input, shape index: {}]   ;;  %s1266_s7 = inlined_call_operand.hbm [shape: f32[16,128], index: 7, kind: output, shape index: {}]  }
   0x1   :  { %1267 = sst [smem:[#allocation15_spill]] %s1260_s1 }
   0x2   :  { %12 = vsyncpa [#allocation3], 0 }
   0x3   :  { %14 = vsyncpa [#allocation3 + $0x1], 0 }
   0x4   :  { %15 = vsyncpa [#allocation6], 0 }
   0x5   :  { %16 = vsyncpa [#allocation9], 0 }
   0x6   :  { %17 = vsyncpa [#allocation4], 0 }
   0x7   :  { %19 = vsyncpa [#allocation4 + $0x1], 0  ;;  %s1090_s24 = smov 0   ;;  %s1092_s25 = smov 0  }
   0x8   :  { %s1094_s26 = smov 0   ;;  %s1096_s27 = smov 0  }
   0x9 LB: > { %s1268_s1 = sld [smem:[#allocation15_spill]]  ;;  %s1114_s8 = sadd.s32 4294967295, %s1043_s27   ;;  %s1043_s27 = sphi %s1096_s27, %s1279_s27   ;;  %s1039_s26 = sphi %s1094_s26, %s1278_s26   ;;  %s1035_s25 = sphi %s1092_s25, %s1277_s25   ;;  %s1031_s24 = sphi %s1090_s24, %s1276_s24  }
   0xa   : > { %p664_p0 = scmp.ge.s32.totalorder %s1043_s27, 1  ;;  %p46_p1 = scmp.eq.s32.totalorder %s1114_s8, 0 }
   0xb   : > { %p208_p2 = scmp.lt.s32.totalorder %s1043_s27, 3  ;;  %s1045_s10 = smov [#allocation5]  }
   0xc   : > { %s221_s11 = sshll.u32 %s1045_s10, 4  ;;  %s236_s14 = sshll.u32 %s1262_s3, 4  ;;  %s222_s11 = int_to_ptr.vmem [resolvable:$true] %s221_s11  ;;  %s237_s14 = int_to_ptr.hbm [resolvable:$true] %s236_s14 }
   0xd   : > { %p1119_p3 = pnand %p664_p0, %p208_p2  ;;  %s253_s18 = sshll.u32 %s1264_s5, 4  ;;  %s254_s18 = int_to_ptr.hbm [resolvable:$true] %s253_s18 }
   0xe   : > { %s1046_s19 = smov [#allocation7]   ;;  %s1047_s21 = smov 64  }
   0xf   : > { %s219_s30 = sshll.u32 %s1268_s1, 4  ;;  %p783_p4 = pneg %p1119_p3  ;;  %s220_s30 = int_to_ptr.hbm [resolvable:$true] %s219_s30 }
  0x10   : > { %s238_s20 = sshll.u32 %s1046_s19, 4  ;;  %s1048_s22 = smov 4   ;;  %s239_s20 = int_to_ptr.vmem [resolvable:$true] %s238_s20 }
  0x11   : > { %p1131_p6 = pnand %p783_p4, %p46_p1  ;;  %s1049_s23 = smov [#allocation8]  }
  0x12   : > { %s255_s28 = sshll.u32 %s1049_s23, 4  ;;  %s663_s29 = sadd.s32 4294967294, %s1043_s27   ;;  %s256_s28 = int_to_ptr.vmem [resolvable:$true] %s255_s28 }
  0x13   : > { %786 = dma.hbm_to_vmem [thread:$0]  (!%p1131_p6), %s220_s30, 128, %s222_s11, [#allocation6], %s1047_s21, %s1047_s21, %s1048_s22  }
  0x14   : > { %789 = dma.hbm_to_vmem [thread:$0]  (!%p1131_p6), %s237_s14, 1024, %s239_s20, [#allocation6], %s1047_s21, %s1047_s21, %s1048_s22  }
  0x15   : > { %792 = dma.hbm_to_vmem [thread:$0]  (!%p1131_p6), %s254_s18, 1024, %s256_s28, [#allocation9], %s1047_s21, %s1047_s21, %s1048_s22  }
  0x16   : > { %s1146_s10 = sadd.s32 1, %s1043_s27   ;;  %s32_s12 = sadd.s32 1, %s1039_s26 }
  0x17   : > { %s29_s30 = ssub.s32 %s1043_s27, %s1146_s10  ;;  %p39_p7 = scmp.ne.s32.totalorder %s1039_s26, %s1035_s25 }
  0x18   : > { %p30_p8 = scmp.eq.s32.totalorder %s29_s30, 0  ;;  %p40_p9 = scmp.eq.s32.totalorder %s1043_s27, 0 }
  0x19   : > { %p45_p10 = scmp.ne.s32.totalorder %s1035_s25, %s1031_s24  ;;  %p195_p11 = scmp.eq.s32.totalorder %s1114_s8, 1 }
  0x1a   : > { %s1158_s11 = scalar_select %p30_p8, %s1039_s26, %s32_s12  }
  0x1b   : > { %p1162_p12 = por %p46_p1, %p45_p10  ;;  %p1166_p13 = por %p195_p11, %p39_p7 }
  0x1c   : > { %p201_p0 = scmp.eq.s32.totalorder %s663_s29, 1  ;;  %p41_p2 = por %p40_p9, %p39_p7 }
  0x1d   : > { %s272_s15 = sand.u32 1, %s1039_s26   ;;  %p804_p6 = scmp.lt.s32.totalorder %s1043_s27, 2 }
  0x1e   : > { %p1171_p4 = por %p201_p0, %p45_p10  ;;  %s669_s17 = sshll.u32 %s272_s15, 3 }
  0x1f   : > { %s670_s18 = sshll.u32 %s1043_s27, 3  ;;  %s276_s23 = scalar_lea.vmem [#allocation2], %s669_s17 }
  0x20   : > { %s280_s21 = scalar_lea.hbm %s1259_s0, %s670_s18  ;;  %s284_s28 = sshll.u32 %s276_s23, 4  ;;  %s285_s28 = int_to_ptr.vmem [resolvable:$true] %s284_s28 }
  0x21   : > { %s282_s22 = sshll.u32 %s280_s21, 4  ;;  %p1180_p8 = pnand %p804_p6, %p41_p2  ;;  %s283_s22 = int_to_ptr.hbm [resolvable:$true] %s282_s22 }
  0x22   : > { %s273_s12 = scalar_lea.sflag [#allocation3], %s272_s15  ;;  %s939_s30 = sshra.s32 %s283_s22, 4  ;;  %s940_s30 = int_to_ptr.hbm [resolvable:$true] %s939_s30 }
  0x23   : > { %s941_s1 = scalar_lea.hbm %s940_s30, 8  ;;  %p943_p9 = pneg %p1180_p8 }
  0x24   : > { %p942_p7 = scmp.ne.s32.totalorder %s940_s30, %s941_s1  ;;  %s946_s17 = scalar_lea.hbm %s1259_s0, 16 }
  0x25   : > { %p947_p0 = scmp.lt.s32.totalorder %s940_s30, %s1259_s0  ;;  %p948_p2 = scmp.lt.s32.totalorder %s946_s17, %s941_s1 }
  0x26   : > { %p944_p10 = pnand %p943_p9, %p942_p7 }
  0x27   : > { %p949_p6 = por %p948_p2, %p947_p0 }
  0x28   : > { %p945_p11 = pneg %p944_p10 }
  0x2a   : > { %p950_p5 = pnand %p949_p6, %p945_p11 }
  0x2c   : > { %953 = shalt.err (!%p950_p5)
}
  0x2d   : > { %796 = dma.hbm_to_vmem [thread:$0]  (!%p1180_p8), %s283_s22, 128, %s285_s28, %s273_s12  }
  0x2e   : > { %293 = sbr.rel (%p1119_p3) target bundleno = 467 (0x1d3), region = 48  ;;  %s1197_s15 = sand.u32 (!%p1119_p3), 1, %s1035_s25  }
  0x2f   : > { %s672_s23 = sshll.u32 (!%p1119_p3), %s1197_s15, 3  ;;  %s296_s18 = scalar_lea.sflag (!%p1119_p3), [#allocation3], %s1197_s15 }
  0x30   : > { %s299_s1 = scalar_lea.vmem (!%p1119_p3), [#allocation2], %s672_s23 }
  0x33   : > { %1014 = dma.done.wait (%p1162_p12), %s296_s18, 128  }
  0x34   : > { %1016 = vsyncadd (%p1162_p12), %s296_s18, 4294967168 }
  0x35   : > { %1018 = dma.done.wait (%p46_p1), [#allocation6], 1152  }
  0x36   : > { %1020 = vsyncadd (%p46_p1), [#allocation6], 4294966144 }
  0x37   : > { %1022 = dma.done.wait (%p46_p1), [#allocation9], 1024  }
  0x38   : > { %1024 = vsyncadd (%p46_p1), [#allocation9], 4294966272  ;;  %v679_v0 = vld [vmem:[#allocation5] sm:$0xf]  ;;  %v750_v1 = vld [vmem:[#allocation5] sm:$0x10] }
  0x39   : > { %vm364_vm0 = vcmask 1044480   ;;  %v347_v2 = vld [vmem:[%s299_s1] sm:$0xff]  ;;  %v680_v3 = vor.u32 %v750_v1, %v679_v0  ;;  %v758_v4 = vld [vmem:[#allocation7 + $0x38] sm:$0xff]  ;;  %vm360_vm1 = vcmask 80896   ;;  %v755_v9 = vld [vmem:[#allocation7 + $0x20] sm:$0xff]  ;;  %s747_s29 = sshll.u32 %s1114_s8, 3 }
  0x3a   : > { %v348_v6 = vpack.c.bf16 %v347_v2, %v347_v2  ;;  %451 = vmatpush.bf16.msra.mxu1 %v758_v4  ;;  %v757_v7 = vld [vmem:[#allocation7 + $0x30] sm:$0xff]  ;;  %v756_v8 = vld [vmem:[#allocation7 + $0x28] sm:$0xff]  ;;  %v754_v10 = vld [vmem:[#allocation7 + $0x18] sm:$0xff]  ;;  %s559_s19 = scalar_lea.hbm %s1266_s7, %s747_s29  ;;  %s345_s21 = scalar_lea.vmem [#allocation10], %s672_s23 }
  0x3b   : > { %v366_v5 = vsel %vm364_vm0, %v680_v3, 0  ;;  %v753_v11 = vld [vmem:[#allocation7 + $0x10] sm:$0xff]  ;;  %v752_v12 = vld [vmem:[#allocation7 + $0x8] sm:$0xff]  ;;  %v751_v13 = vld [vmem:[#allocation7] sm:$0xff]  ;;  %s561_s18 = sshll.u32 %s345_s21, 4  ;;  %s563_s1 = sshll.u32 %s559_s19, 4  ;;  %s562_s18 = int_to_ptr.vmem [resolvable:$true] %s561_s18  ;;  %s564_s1 = int_to_ptr.hbm [resolvable:$true] %s563_s1 }
  0x3c   : > { %375 = vmatpush.bf16.msra.mxu0 %v366_v5  ;;  %v766_v14 = vld [vmem:[#allocation8 + $0x38] sm:$0xff]  ;;  %v765_v15 = vld [vmem:[#allocation8 + $0x30] sm:$0xff]  ;;  %v764_v16 = vld [vmem:[#allocation8 + $0x28] sm:$0xff]  ;;  %s549_s9 = scalar_lea.sflag [#allocation4], %s1197_s15  ;;  %s983_s8 = sshra.s32 %s564_s1, 4  ;;  %s984_s8 = int_to_ptr.hbm [resolvable:$true] %s983_s8 }
  0x3d   : > { %534 = vmatpush.bf16.msra.mxu2 %v766_v14  ;;  %v763_v17 = vld [vmem:[#allocation8 + $0x20] sm:$0xff]  ;;  %v762_v18 = vld [vmem:[#allocation8 + $0x18] sm:$0xff]  ;;  %v761_v19 = vld [vmem:[#allocation8 + $0x10] sm:$0xff]  ;;  %s985_s13 = scalar_lea.hbm %s984_s8, 8  ;;  %s989_s29 = scalar_lea.hbm %s1266_s7, 16 }
  0x3e   : > { %452 = vmatpush.bf16.msra.mxu1 %v757_v7  ;;  %v846_v20 = vld [vmem:[%s1261_s2] ss:$0 sm:$0xff]  ;;  %v759_v27 = vld [vmem:[#allocation8] sm:$0xff]  ;;  %p986_p1 = scmp.ne.s32.totalorder %s984_s8, %s985_s13  ;;  %p990_p12 = scmp.lt.s32.totalorder %s984_s8, %s1266_s7 }
  0x3f   : > { %681 = vmatmul.msk.bf16.vlgmr.msra.gmra.mxu0 %vm360_vm1, %v348_v6  ;;  %v760_v26 = vld [vmem:[#allocation8 + $0x8] sm:$0xff]  ;;  %p991_p8 = scmp.lt.s32.totalorder %s989_s29, %s985_s13 }
  0x40   : > { %v847_v28 = vld [vmem:[%s1263_s4] ss:$0 sm:$0xff]  ;;  %p987_p3 = pnand %p986_p1, %p1166_p13 }
  0x41   : > { %535 = vmatpush.bf16.msra.mxu2 %v765_v15  ;;  %v848_v34 = vld [vmem:[%s1265_s6] ss:$0 sm:$0xff]  ;;  %p992_p7 = por %p991_p8, %p990_p12 }
  0x42   : > { %453 = vmatpush.bf16.msra.mxu1 %v756_v8  ;;  %p988_p5 = pneg %p987_p3 }
  0x44   : > { %p993_p9 = pnand %p992_p7, %p988_p5 }
  0x45   : > { %536 = vmatpush.bf16.msra.mxu2 %v764_v16 }
  0x46   : > { %454 = vmatpush.bf16.msra.mxu1 %v755_v9 }
  0x49   : > { %537 = vmatpush.bf16.msra.mxu2 %v763_v17 }
  0x4a   : > { %455 = vmatpush.bf16.msra.mxu1 %v754_v10 }
  0x4d   : > { %538 = vmatpush.bf16.msra.mxu2 %v762_v18 }
  0x4e   : > { %456 = vmatpush.bf16.msra.mxu1 %v753_v11 }
  0x51   : > { %539 = vmatpush.bf16.msra.mxu2 %v761_v19 }
  0x52   : > { %457 = vmatpush.bf16.msra.mxu1 %v752_v12 }
  0x55   : > { %540 = vmatpush.bf16.msra.mxu2 %v760_v26 }
  0x56   : > { %458 = vmatpush.bf16.msra.mxu1 %v751_v13 }
  0x59   : > { %541 = vmatpush.bf16.msra.mxu2 %v759_v27 }
  0xbc   : > { %v377_v21 = vpop.f32.mrf.mxu0 }
  0xbd   : > { %v378_v22 = vadd.f32 %v846_v20, %v377_v21 }
  0xbf   : > { %v381_v23 = vmax.f32 %v378_v22, 0.0 }
  0xc1   : > { %v382_v24 = vpack.c.bf16 %v381_v23, %v381_v23 }
  0xc3   : > { %459 = vmatmul.bf16.vlgmr.msra.gmra.mxu1 %v382_v24 }
  0xc4   : > { %v379_v25 = vpop.f32.mrf.mxu0 }
 0x140   : > { %v460_v29 = vpop.f32.mrf.mxu1 }
 0x141   : > { %v461_v30 = vadd.f32 %v847_v28, %v460_v29 }
 0x143   : > { %v464_v31 = vmax.f32 %v461_v30, 0.0 }
 0x145   : > { %v465_v32 = vpack.c.bf16 %v464_v31, %v464_v31 }
 0x147   : > { %542 = vmatmul.bf16.vlgmr.msra.gmra.mxu2 %v465_v32 }
 0x148   : > { %v462_v33 = vpop.f32.mrf.mxu1 }
 0x1ca   : > { %v543_v35 = vpop.f32.mrf.mxu2 }
 0x1cb   : > { %v544_v36 = vadd.f32 %v848_v34, %v543_v35 }
 0x1cd   : > { %547 = vst [vmem:[%s345_s21] sm:$0xff] %v544_v36 }
 0x1ce   : > { %996 = shalt.err (!%p993_p9)
}
 0x1cf   : > { %781 = dma.vmem_to_hbm [thread:$0]  (%p1166_p13), %s562_s18, 128, %s564_s1, %s549_s9  }
 0x1d2   : > { %v545_v37 = vpop.f32.mrf.mxu2 }
 0x1d3 PF: > { %s575_s15 = sand.u32 1, %s1031_s24   ;;  %p1275_p10 = scmp.ge.s32.totalorder %s1043_s27, 2 }
 0x1d4   : > { %s576_s30 = scalar_lea.sflag [#allocation4], %s575_s15 }
 0x1d5   : > { %p798_p11 = pnand %p1275_p10, %p1171_p4 }
 0x1d7   : > { %p799_p0 = pneg %p798_p11 }
 0x1d9   : > { %1026 = dma.done.wait (%p799_p0), %s576_s30, 128  }
 0x1da   : > { %1028 = vsyncadd (%p799_p0), %s576_s30, 4294967168  ;;  %p22_p2 = scmp.ge.s32.totalorder %s1146_s10, 4   ;;  %s1276_s24 = smov %s1035_s25 }
 0x1db   : > { %s1277_s25 = smov %s1039_s26  ;;  %s1278_s26 = smov %s1158_s11 }
 0x1dc   : > { %s1279_s27 = smov %s1146_s10  ;;  %24 = sbr.rel (!%p22_p2) target bundleno = 9 (0x9), region = 105 }
 0x1e1   :  { %582 = vsyncpa [#allocation3], 1 }
 0x1e2   :  { %584 = vsyncpa [#allocation3 + $0x1], 1 }
 0x1e3   :  { %585 = vsyncpa [#allocation6], 1 }
 0x1e4   :  { %586 = vsyncpa [#allocation9], 1 }
 0x1e5   :  { %587 = vsyncpa [#allocation4], 1 }
 0x1e6   :  { %589 = vsyncpa [#allocation4 + $0x1], 1 }

</bundles_post_ra>
